<compile_context>
chip_gen: v6e
topology: v6e:2x2x1
jax: 0.10.0
libtpu: 0.0.40
codegen_flags: <defaults>
</compile_context>

<pallas_src>
import functools
import math

import jax
import jax.numpy as jnp
from jax import lax
from jax.experimental import pallas as pl
from jax.experimental.pallas import tpu as pltpu


# ------------------------------- Pallas kernel -------------------------------
def _encoding_layer_kernel(
    x_ref, bias_ref,
    g1_ref, g2_ref,
    wqkv_ref, bqkv_ref,
    wo_ref, bo_ref,
    w1_ref, b1_ref,
    w2_ref, b2_ref,
    *rest,
    num_heads, eps, keep_scale, training,
):
    if training:
        d1_ref, dff_ref, d2_ref, out_ref, attn_acc = rest
    else:
        out_ref, attn_acc = rest

    f32, bf16 = jnp.float32, jnp.bfloat16
    Bt, T, D = x_ref.shape
    H = num_heads
    hd = D // H
    BT = Bt * T
    scale = 1.0 / math.sqrt(hd)

    x = x_ref[...].reshape(BT, D)                            # (Bt*T, D) f32

    # ---------------- RMSNorm 1 (f32 stats) -> bf16 matmul operand ----------------
    ms = jnp.mean(x * x, axis=-1, keepdims=True)
    xn = (x * lax.rsqrt(ms + eps) * g1_ref[...]).astype(bf16)

    # ---------------- fused QKV projection (bf16 MXU, f32 accumulation) -----------
    qkv = jnp.dot(xn, wqkv_ref[...], preferred_element_type=f32) + bqkv_ref[...]
    q = (qkv[:, 0 * D:1 * D] * scale).astype(bf16)           # fold 1/sqrt(hd) into q
    k = qkv[:, 1 * D:2 * D].astype(bf16)
    v = qkv[:, 2 * D:3 * D].astype(bf16)

    bias = bias_ref[...]          # (T, T) additive mask (0 / -1e9), hoisted out of loops
    wo = wo_ref[...]              # (D, D) bf16

    # ---------------- multi-head attention, out-proj fused per head ---------------
    # TODO(synk): for T >= ~1k switch the inner part to a flash-style query-tile loop,
    # and for realistic D repack wqkv columns host-side so head slices are 128-lane
    # aligned (demo hd=8 is unavoidably sub-lane).
    for b in range(Bt):                                      # static unroll over rows
        r0 = b * T
        acc = jnp.zeros((T, D), f32)
        for h in range(H):                                   # static unroll over heads
            c0 = h * hd
            qh = q[r0:r0 + T, c0:c0 + hd]
            kh = k[r0:r0 + T, c0:c0 + hd]
            vh = v[r0:r0 + T, c0:c0 + hd]
            # q @ k^T without materializing a transpose: contract the hd axis.
            s = lax.dot_general(qh, kh, (((1,), (1,)), ((), ())),
                                preferred_element_type=f32)
            s = s + bias
            m = jnp.max(s, axis=-1, keepdims=True)
            p = jnp.exp(s - m)
            l = jnp.sum(p, axis=-1, keepdims=True)
            p = (p * pl.reciprocal(l, approx=True)).astype(bf16)   # EUP reciprocal
            ctx = jnp.dot(p, vh, preferred_element_type=f32).astype(bf16)  # (T, hd)
            # fuse the output projection: no head concat, no (T, D) temporary
            acc = acc + jnp.dot(ctx, wo[c0:c0 + hd, :], preferred_element_type=f32)
        attn_acc[r0:r0 + T, :] = acc + bo_ref[...]           # aligned scratch write

    attn = attn_acc[...]
    if training:
        attn = attn * (d1_ref[...].reshape(BT, D).astype(f32) * keep_scale)
    x = x + attn                                             # residual 1

    # ---------------- RMSNorm 2 + FFN ----------------
    # TODO(synk): on v7x (64 MiB VMEM) with D >= ~1536 additionally K-tile the 4*D
    # hidden axis of w1/w2 with accumulation instead of keeping them fully resident.
    ms2 = jnp.mean(x * x, axis=-1, keepdims=True)
    xn2 = (x * lax.rsqrt(ms2 + eps) * g2_ref[...]).astype(bf16)
    h1 = jnp.dot(xn2, w1_ref[...], preferred_element_type=f32) + b1_ref[...]
    h1 = jnp.maximum(h1, 0.0)                                # ReLU
    if training:
        h1 = h1 * (dff_ref[...].reshape(BT, 4 * D).astype(f32) * keep_scale)
    y = jnp.dot(h1.astype(bf16), w2_ref[...], preferred_element_type=f32) + b2_ref[...]
    if training:
        y = y * (d2_ref[...].reshape(BT, D).astype(f32) * keep_scale)

    out_ref[...] = (x + y).reshape(Bt, T, D)                 # residual 2


# --------------------------------- helpers ------------------------------------
def _pick_batch_block(B, T, target_rows=256):
    """Rows per grid step: fill the MXU M dim (~256 rows) while keeping the
    parallel grid axis length >= 2 when possible (v7x has 2 TensorCores)."""
    bt = max(1, min(B, -(-target_rows // max(T, 1))))        # ceil(target/T)
    while bt > 1 and B % bt:                                 # even blocks only
        bt -= 1
    if bt == B and B >= 2:                                   # leave >= 2 grid steps
        bt = B // 2
        while bt > 1 and B % bt:
            bt -= 1
    return max(bt, 1)


def _vmem_limit_bytes(bt, T, D, training):
    bf, f4 = 2, 4
    weights = (3 * D * D + D * D + 4 * D * D + 4 * D * D) * bf   # bf16, single-buffered
    small = (3 * D + D + 4 * D + D + 2 * D) * f4 + T * T * f4    # biases, gains, mask
    io = 2 * 2 * bt * T * D * f4                                 # x & out, double-buffered
    drop = 2 * bt * T * 6 * D if training else 0                 # int8 masks, dbl-buffered
    scratch = bt * T * D * f4
    transient = bt * T * (3 * D + 8 * D + 2 * D) * f4            # qkv, h1/dff, temporaries
    est = weights + small + io + drop + scratch + transient
    return int(min(100 * 2 ** 20, max(32 * 2 ** 20, 2 * est)))


# --------------------------------- wrapper ------------------------------------
def encoding_layer_forward(x, mask, params, *, num_heads,
                           dropout_masks=None, dropout_p=0.2, eps=1e-6,
                           batch_block=None):
    """x: (B, T, D) f32; mask: (T, T) (1=keep, 0=mask).
    dropout_masks: None (eval) or (d1 (B,T,D), dff (B,T,4D), d2 (B,T,D)) int8 keep-masks."""
    B, T, D = x.shape
    H4 = 4 * D
    training = dropout_masks is not None
    keep_scale = 1.0 / (1.0 - dropout_p) if training else 1.0
    g1, g2, wqkv, bqkv, wo, bo, w1, b1, w2, b2 = params

    bt = batch_block or _pick_batch_block(B, T)
    grid = (B // bt,)

    # additive attention bias (0 / -1e9), computed once host-side
    mask_bias = jnp.where(mask == 0, jnp.float32(-1e9), jnp.float32(0.0))

    kernel = functools.partial(
        _encoding_layer_kernel, num_heads=num_heads, eps=eps,
        keep_scale=keep_scale, training=training)

    def const_spec(shape):
        # block index never changes -> single-buffer to halve its resident VMEM
        return pl.BlockSpec(shape, lambda i: (0,) * len(shape),
                            pipeline_mode=pl.Buffered(1))

    def batch_spec(last):
        return pl.BlockSpec((bt, T, last), lambda i: (i, 0, 0))

    in_specs = [
        batch_spec(D),                  # x
        const_spec((T, T)),             # additive attention bias
        const_spec((1, D)),             # norm1 gain
        const_spec((1, D)),             # norm2 gain
        const_spec((D, 3 * D)),         # qkv weight (bf16)
        const_spec((1, 3 * D)),         # qkv bias
        const_spec((D, D)),             # out-proj weight (bf16)
        const_spec((1, D)),             # out-proj bias
        const_spec((D, H4)),            # ffn linear1 weight (bf16)
        const_spec((1, H4)),            # ffn linear1 bias
        const_spec((H4, D)),            # ffn linear2 weight (bf16)
        const_spec((1, D)),             # ffn linear2 bias
    ]
    args = [x, mask_bias, g1, g2, wqkv, bqkv, wo, bo, w1, b1, w2, b2]

    if training:
        d1, dff, d2 = dropout_masks
        in_specs += [batch_spec(D), batch_spec(H4), batch_spec(D)]
        args += [d1, dff, d2]

    return pl.pallas_call(
        kernel,
        out_shape=jax.ShapeDtypeStruct((B, T, D), jnp.float32),
        grid=grid,
        in_specs=in_specs,
        out_specs=batch_spec(D),
        scratch_shapes=[pltpu.VMEM((bt * T, D), jnp.float32)],
        compiler_params=pltpu.CompilerParams(
            dimension_semantics=("parallel",),
            vmem_limit_bytes=_vmem_limit_bytes(bt, T, D, training)),
    )(*args)


# ---------------------------- host-side parameter prep ------------------------
def init_params(key, d_model):
    ks = jax.random.split(key, 4)

    def linear(k, fan_in, fan_out):
        kw, kb = jax.random.split(k)
        bound = 1.0 / math.sqrt(fan_in)
        w = jax.random.uniform(kw, (fan_in, fan_out), jnp.float32, -bound, bound)
        b = jax.random.uniform(kb, (1, fan_out), jnp.float32, -bound, bound)
        return w.astype(jnp.bfloat16), b      # bf16 weights (MXU-native), f32 biases

    g1 = jnp.ones((1, d_model), jnp.float32)
    g2 = jnp.ones((1, d_model), jnp.float32)
    wqkv, bqkv = linear(ks[0], d_model, 3 * d_model)
    wo, bo = linear(ks[1], d_model, d_model)
    w1, b1 = linear(ks[2], d_model, 4 * d_model)
    w2, b2 = linear(ks[3], 4 * d_model, d_model)
    return (g1, g2, wqkv, bqkv, wo, bo, w1, b1, w2, b2)


def make_dropout_masks(key, B, T, D, p):
    # int8 keep-masks (0/1): 4x less HBM traffic than f32; 1/(1-p) applied in-kernel.
    # TODO(synk): pltpu.prng_random_bits in-kernel would remove this traffic entirely,
    # at the cost of not being bit-reproducible against a host-side reference.
    k1, k2, k3 = jax.random.split(key, 3)
    d1 = jax.random.bernoulli(k1, 1.0 - p, (B, T, D)).astype(jnp.int8)
    dff = jax.random.bernoulli(k2, 1.0 - p, (B, T, 4 * D)).astype(jnp.int8)
    d2 = jax.random.bernoulli(k3, 1.0 - p, (B, T, D)).astype(jnp.int8)
    return d1, dff, d2


# ------------------------------ pure-JAX reference -----------------------------
def reference_forward(x, mask, params, *, num_heads, dropout_masks=None,
                      dropout_p=0.2, eps=1e-6):
    """Mirrors the kernel's numerics (bf16 matmul operands, f32 accumulation)."""
    g1, g2, wqkv, bqkv, wo, bo, w1, b1, w2, b2 = params
    B, T, D = x.shape
    H = num_heads
    hd = D // H
    scale = 1.0 / math.sqrt(hd)
    f32, bf16 = jnp.float32, jnp.bfloat16
    keep_scale = 1.0 / (1.0 - dropout_p)

    def rms(v, g):
        return v * lax.rsqrt(jnp.mean(v * v, -1, keepdims=True) + eps) * g

    xn = rms(x, g1).astype(bf16)
    qkv = jnp.dot(xn, wqkv, preferred_element_type=f32) + bqkv
    q = (qkv[..., :D] * scale).astype(bf16).reshape(B, T, H, hd).transpose(0, 2, 1, 3)
    k = qkv[..., D:2 * D].astype(bf16).reshape(B, T, H, hd).transpose(0, 2, 1, 3)
    v = qkv[..., 2 * D:].astype(bf16).reshape(B, T, H, hd).transpose(0, 2, 1, 3)
    s = jnp.einsum("bhqd,bhkd->bhqk", q, k, preferred_element_type=f32)
    s = jnp.where(mask[None, None] == 0, -1e9, s)
    p = jax.nn.softmax(s, axis=-1)
    ctx = jnp.einsum("bhqk,bhkd->bhqd", p.astype(bf16), v, preferred_element_type=f32)
    a = ctx.transpose(0, 2, 1, 3).reshape(B, T, D)
    a = jnp.dot(a.astype(bf16), wo, preferred_element_type=f32) + bo
    if dropout_masks is not None:
        a = a * (dropout_masks[0].astype(f32) * keep_scale)
    x = x + a
    h1 = jnp.dot(rms(x, g2).astype(bf16), w1, preferred_element_type=f32) + b1
    h1 = jnp.maximum(h1, 0.0)
    if dropout_masks is not None:
        h1 = h1 * (dropout_masks[1].astype(f32) * keep_scale)
    y = jnp.dot(h1.astype(bf16), w2, preferred_element_type=f32) + b2
    if dropout_masks is not None:
        y = y * (dropout_masks[2].astype(f32) * keep_scale)
    return x + y


# ------------------------------------ demo -------------------------------------
if __name__ == "__main__":
    B, T, D, H = 2, 8, 32, 4
    P_DROP = 0.2

    key = jax.random.PRNGKey(0)
    k_x, k_p, k_d = jax.random.split(key, 3)

    x = jax.random.normal(k_x, (B, T, D), dtype=jnp.float32)
    mask = jnp.tril(jnp.ones((T, T), dtype=jnp.int32))          # causal mask
    params = init_params(k_p, D)

    # eval mode (dropout = identity) — compare against pure-JAX reference
    out_eval = encoding_layer_forward(x, mask, params, num_heads=H)
    jax.block_until_ready(out_eval)
    ref_eval = reference_forward(x, mask, params, num_heads=H)
    assert out_eval.shape == (B, T, D)
    assert jnp.allclose(out_eval, ref_eval, atol=2e-2, rtol=2e-2), "eval mismatch"

    # training mode — same int8 keep-masks fed to kernel and reference
    masks = make_dropout_masks(k_d, B, T, D, P_DROP)
    out_train = encoding_layer_forward(x, mask, params, num_heads=H,
                                       dropout_masks=masks, dropout_p=P_DROP)
    jax.block_until_ready(out_train)
    ref_train = reference_forward(x, mask, params, num_heads=H,
                                  dropout_masks=masks, dropout_p=P_DROP)
    assert jnp.allclose(out_train, ref_train, atol=2e-2, rtol=2e-2), "train mismatch"

    print("KERNEL_OK")
</pallas_src>

<mosaic_0001>
module attributes {stable_mosaic.version = 11 : i64} {
  func.func @_encoding_layer_kernel(%arg0: i32, %arg1: memref<1x8x32xf32, #tpu.memory_space<vmem>>, %arg2: memref<8x8xf32, #tpu.memory_space<vmem>>, %arg3: memref<1x32xf32, #tpu.memory_space<vmem>>, %arg4: memref<1x32xf32, #tpu.memory_space<vmem>>, %arg5: memref<32x96xbf16, #tpu.memory_space<vmem>>, %arg6: memref<1x96xf32, #tpu.memory_space<vmem>>, %arg7: memref<32x32xbf16, #tpu.memory_space<vmem>>, %arg8: memref<1x32xf32, #tpu.memory_space<vmem>>, %arg9: memref<32x128xbf16, #tpu.memory_space<vmem>>, %arg10: memref<1x128xf32, #tpu.memory_space<vmem>>, %arg11: memref<128x32xbf16, #tpu.memory_space<vmem>>, %arg12: memref<1x32xf32, #tpu.memory_space<vmem>>, %arg13: memref<1x8x32xf32, #tpu.memory_space<vmem>>, %arg14: memref<8x32xf32, #tpu.memory_space<vmem>>) attributes {dimension_semantics = [#tpu.dimension_semantics<parallel>], iteration_bounds = array<i64: 2>, scalar_prefetch = 0 : i64, scratch_operands = 1 : i64, tpu.core_type = #tpu.core_type<tc>, window_params = [{transform_indices = @transform_0, window_bounds = array<i64: 1, 8, 32>}, {pipeline_mode = #tpu.pipeline_mode<synchronous>, transform_indices = @transform_1, window_bounds = array<i64: 8, 8>}, {pipeline_mode = #tpu.pipeline_mode<synchronous>, transform_indices = @transform_2, window_bounds = array<i64: 1, 32>}, {pipeline_mode = #tpu.pipeline_mode<synchronous>, transform_indices = @transform_3, window_bounds = array<i64: 1, 32>}, {pipeline_mode = #tpu.pipeline_mode<synchronous>, transform_indices = @transform_4, window_bounds = array<i64: 32, 96>}, {pipeline_mode = #tpu.pipeline_mode<synchronous>, transform_indices = @transform_5, window_bounds = array<i64: 1, 96>}, {pipeline_mode = #tpu.pipeline_mode<synchronous>, transform_indices = @transform_6, window_bounds = array<i64: 32, 32>}, {pipeline_mode = #tpu.pipeline_mode<synchronous>, transform_indices = @transform_7, window_bounds = array<i64: 1, 32>}, {pipeline_mode = #tpu.pipeline_mode<synchronous>, transform_indices = @transform_8, window_bounds = array<i64: 32, 128>}, {pipeline_mode = #tpu.pipeline_mode<synchronous>, transform_indices = @transform_9, window_bounds = array<i64: 1, 128>}, {pipeline_mode = #tpu.pipeline_mode<synchronous>, transform_indices = @transform_10, window_bounds = array<i64: 128, 32>}, {pipeline_mode = #tpu.pipeline_mode<synchronous>, transform_indices = @transform_11, window_bounds = array<i64: 1, 32>}, {transform_indices = @transform_12, window_bounds = array<i64: 1, 8, 32>}]} {
    %c0 = arith.constant 0 : index
    %c0_0 = arith.constant 0 : index
    %c0_1 = arith.constant 0 : index
    %0 = vector.load %arg1[%c0, %c0_0, %c0_1] : memref<1x8x32xf32, #tpu.memory_space<vmem>>, vector<1x8x32xf32>
    %1 = vector.shape_cast %0 : vector<1x8x32xf32> to vector<8x32xf32>
    %2 = arith.mulf %1, %1 : vector<8x32xf32>
    %cst = arith.constant dense<0.000000e+00> : vector<8xf32>
    %3 = vector.multi_reduction <add>, %2, %cst [1] : vector<8x32xf32> to vector<8xf32>
    %4 = vector.shape_cast %3 : vector<8xf32> to vector<8x1xf32>
    %cst_2 = arith.constant 3.200000e+01 : f32
    %5 = vector.broadcast %cst_2 : f32 to vector<8x1xf32>
    %6 = arith.divf %4, %5 : vector<8x1xf32>
    %cst_3 = arith.constant 9.99999997E-7 : f32
    %7 = vector.broadcast %cst_3 : f32 to vector<8x1xf32>
    %8 = arith.addf %6, %7 : vector<8x1xf32>
    %9 = math.rsqrt %8 : vector<8x1xf32>
    %10 = vector.broadcast %9 : vector<8x1xf32> to vector<8x32xf32>
    %11 = arith.mulf %1, %10 : vector<8x32xf32>
    %c0_4 = arith.constant 0 : index
    %c0_5 = arith.constant 0 : index
    %12 = vector.load %arg3[%c0_4, %c0_5] : memref<1x32xf32, #tpu.memory_space<vmem>>, vector<1x32xf32>
    %13 = vector.broadcast %12 : vector<1x32xf32> to vector<8x32xf32>
    %14 = arith.mulf %11, %13 : vector<8x32xf32>
    %15 = arith.truncf %14 : vector<8x32xf32> to vector<8x32xbf16>
    %c0_6 = arith.constant 0 : index
    %c0_7 = arith.constant 0 : index
    %16 = vector.load %arg5[%c0_6, %c0_7] : memref<32x96xbf16, #tpu.memory_space<vmem>>, vector<32x96xbf16>
    %cst_8 = arith.constant dense<0.000000e+00> : vector<8x96xf32>
    %17 = tpu.matmul %15, %16, %cst_8 {dimension_numbers = #tpu.dot_dimension_numbers<[1], [0], [0], [1], [0, 0, 1, 1], [], []>} : vector<8x32xbf16>, vector<32x96xbf16>, vector<8x96xf32> -> vector<8x96xf32>
    %c0_9 = arith.constant 0 : index
    %c0_10 = arith.constant 0 : index
    %18 = vector.load %arg6[%c0_9, %c0_10] : memref<1x96xf32, #tpu.memory_space<vmem>>, vector<1x96xf32>
    %19 = vector.broadcast %18 : vector<1x96xf32> to vector<8x96xf32>
    %20 = arith.addf %17, %19 : vector<8x96xf32>
    %21 = vector.extract_strided_slice %20 {offsets = [0, 0], sizes = [8, 32], strides = [1, 1]} : vector<8x96xf32> to vector<8x32xf32>
    %cst_11 = arith.constant 0.353553385 : f32
    %22 = vector.broadcast %cst_11 : f32 to vector<8x32xf32>
    %23 = arith.mulf %21, %22 : vector<8x32xf32>
    %24 = arith.truncf %23 : vector<8x32xf32> to vector<8x32xbf16>
    %25 = vector.extract_strided_slice %20 {offsets = [0, 32], sizes = [8, 32], strides = [1, 1]} : vector<8x96xf32> to vector<8x32xf32>
    %26 = arith.truncf %25 : vector<8x32xf32> to vector<8x32xbf16>
    %27 = vector.extract_strided_slice %20 {offsets = [0, 64], sizes = [8, 32], strides = [1, 1]} : vector<8x96xf32> to vector<8x32xf32>
    %28 = arith.truncf %27 : vector<8x32xf32> to vector<8x32xbf16>
    %c0_12 = arith.constant 0 : index
    %c0_13 = arith.constant 0 : index
    %29 = vector.load %arg2[%c0_12, %c0_13] : memref<8x8xf32, #tpu.memory_space<vmem>>, vector<8x8xf32>
    %c0_14 = arith.constant 0 : index
    %c0_15 = arith.constant 0 : index
    %30 = vector.load %arg7[%c0_14, %c0_15] : memref<32x32xbf16, #tpu.memory_space<vmem>>, vector<32x32xbf16>
    %cst_16 = arith.constant 0.000000e+00 : f32
    %31 = vector.broadcast %cst_16 : f32 to vector<8x32xf32>
    %32 = vector.extract_strided_slice %24 {offsets = [0, 0], sizes = [8, 8], strides = [1, 1]} : vector<8x32xbf16> to vector<8x8xbf16>
    %33 = vector.extract_strided_slice %26 {offsets = [0, 0], sizes = [8, 8], strides = [1, 1]} : vector<8x32xbf16> to vector<8x8xbf16>
    %34 = vector.extract_strided_slice %28 {offsets = [0, 0], sizes = [8, 8], strides = [1, 1]} : vector<8x32xbf16> to vector<8x8xbf16>
    %cst_17 = arith.constant dense<0.000000e+00> : vector<8x8xf32>
    %35 = tpu.matmul %32, %33, %cst_17 {dimension_numbers = #tpu.dot_dimension_numbers<[1], [1], [0], [0], [0, 0, 1, 0], [], []>} : vector<8x8xbf16>, vector<8x8xbf16>, vector<8x8xf32> -> vector<8x8xf32>
    %36 = arith.addf %35, %29 : vector<8x8xf32>
    %cst_18 = arith.constant dense<0xFF800000> : vector<8xf32>
    %37 = vector.multi_reduction <maximumf>, %36, %cst_18 [1] : vector<8x8xf32> to vector<8xf32>
    %38 = vector.shape_cast %37 : vector<8xf32> to vector<8x1xf32>
    %39 = vector.broadcast %38 : vector<8x1xf32> to vector<8x8xf32>
    %40 = arith.subf %36, %39 : vector<8x8xf32>
    %41 = math.exp %40 : vector<8x8xf32>
    %cst_19 = arith.constant dense<0.000000e+00> : vector<8xf32>
    %42 = vector.multi_reduction <add>, %41, %cst_19 [1] : vector<8x8xf32> to vector<8xf32>
    %43 = vector.shape_cast %42 : vector<8xf32> to vector<8x1xf32>
    %44 = tpu.reciprocal %43 {approx = true} : vector<8x1xf32> -> vector<8x1xf32>
    %45 = vector.broadcast %44 : vector<8x1xf32> to vector<8x8xf32>
    %46 = arith.mulf %41, %45 : vector<8x8xf32>
    %47 = arith.truncf %46 : vector<8x8xf32> to vector<8x8xbf16>
    %cst_20 = arith.constant dense<0.000000e+00> : vector<8x8xf32>
    %48 = tpu.matmul %47, %34, %cst_20 {dimension_numbers = #tpu.dot_dimension_numbers<[1], [0], [0], [1], [0, 0, 1, 1], [], []>} : vector<8x8xbf16>, vector<8x8xbf16>, vector<8x8xf32> -> vector<8x8xf32>
    %49 = arith.truncf %48 : vector<8x8xf32> to vector<8x8xbf16>
    %50 = vector.extract_strided_slice %30 {offsets = [0, 0], sizes = [8, 32], strides = [1, 1]} : vector<32x32xbf16> to vector<8x32xbf16>
    %cst_21 = arith.constant dense<0.000000e+00> : vector<8x32xf32>
    %51 = tpu.matmul %49, %50, %cst_21 {dimension_numbers = #tpu.dot_dimension_numbers<[1], [0], [0], [1], [0, 0, 1, 1], [], []>} : vector<8x8xbf16>, vector<8x32xbf16>, vector<8x32xf32> -> vector<8x32xf32>
    %52 = arith.addf %31, %51 : vector<8x32xf32>
    %53 = vector.extract_strided_slice %24 {offsets = [0, 8], sizes = [8, 8], strides = [1, 1]} : vector<8x32xbf16> to vector<8x8xbf16>
    %54 = vector.extract_strided_slice %26 {offsets = [0, 8], sizes = [8, 8], strides = [1, 1]} : vector<8x32xbf16> to vector<8x8xbf16>
    %55 = vector.extract_strided_slice %28 {offsets = [0, 8], sizes = [8, 8], strides = [1, 1]} : vector<8x32xbf16> to vector<8x8xbf16>
    %cst_22 = arith.constant dense<0.000000e+00> : vector<8x8xf32>
    %56 = tpu.matmul %53, %54, %cst_22 {dimension_numbers = #tpu.dot_dimension_numbers<[1], [1], [0], [0], [0, 0, 1, 0], [], []>} : vector<8x8xbf16>, vector<8x8xbf16>, vector<8x8xf32> -> vector<8x8xf32>
    %57 = arith.addf %56, %29 : vector<8x8xf32>
    %cst_23 = arith.constant dense<0xFF800000> : vector<8xf32>
    %58 = vector.multi_reduction <maximumf>, %57, %cst_23 [1] : vector<8x8xf32> to vector<8xf32>
    %59 = vector.shape_cast %58 : vector<8xf32> to vector<8x1xf32>
    %60 = vector.broadcast %59 : vector<8x1xf32> to vector<8x8xf32>
    %61 = arith.subf %57, %60 : vector<8x8xf32>
    %62 = math.exp %61 : vector<8x8xf32>
    %cst_24 = arith.constant dense<0.000000e+00> : vector<8xf32>
    %63 = vector.multi_reduction <add>, %62, %cst_24 [1] : vector<8x8xf32> to vector<8xf32>
    %64 = vector.shape_cast %63 : vector<8xf32> to vector<8x1xf32>
    %65 = tpu.reciprocal %64 {approx = true} : vector<8x1xf32> -> vector<8x1xf32>
    %66 = vector.broadcast %65 : vector<8x1xf32> to vector<8x8xf32>
    %67 = arith.mulf %62, %66 : vector<8x8xf32>
    %68 = arith.truncf %67 : vector<8x8xf32> to vector<8x8xbf16>
    %cst_25 = arith.constant dense<0.000000e+00> : vector<8x8xf32>
    %69 = tpu.matmul %68, %55, %cst_25 {dimension_numbers = #tpu.dot_dimension_numbers<[1], [0], [0], [1], [0, 0, 1, 1], [], []>} : vector<8x8xbf16>, vector<8x8xbf16>, vector<8x8xf32> -> vector<8x8xf32>
    %70 = arith.truncf %69 : vector<8x8xf32> to vector<8x8xbf16>
    %71 = vector.extract_strided_slice %30 {offsets = [8, 0], sizes = [8, 32], strides = [1, 1]} : vector<32x32xbf16> to vector<8x32xbf16>
    %cst_26 = arith.constant dense<0.000000e+00> : vector<8x32xf32>
    %72 = tpu.matmul %70, %71, %cst_26 {dimension_numbers = #tpu.dot_dimension_numbers<[1], [0], [0], [1], [0, 0, 1, 1], [], []>} : vector<8x8xbf16>, vector<8x32xbf16>, vector<8x32xf32> -> vector<8x32xf32>
    %73 = arith.addf %52, %72 : vector<8x32xf32>
    %74 = vector.extract_strided_slice %24 {offsets = [0, 16], sizes = [8, 8], strides = [1, 1]} : vector<8x32xbf16> to vector<8x8xbf16>
    %75 = vector.extract_strided_slice %26 {offsets = [0, 16], sizes = [8, 8], strides = [1, 1]} : vector<8x32xbf16> to vector<8x8xbf16>
    %76 = vector.extract_strided_slice %28 {offsets = [0, 16], sizes = [8, 8], strides = [1, 1]} : vector<8x32xbf16> to vector<8x8xbf16>
    %cst_27 = arith.constant dense<0.000000e+00> : vector<8x8xf32>
    %77 = tpu.matmul %74, %75, %cst_27 {dimension_numbers = #tpu.dot_dimension_numbers<[1], [1], [0], [0], [0, 0, 1, 0], [], []>} : vector<8x8xbf16>, vector<8x8xbf16>, vector<8x8xf32> -> vector<8x8xf32>
    %78 = arith.addf %77, %29 : vector<8x8xf32>
    %cst_28 = arith.constant dense<0xFF800000> : vector<8xf32>
    %79 = vector.multi_reduction <maximumf>, %78, %cst_28 [1] : vector<8x8xf32> to vector<8xf32>
    %80 = vector.shape_cast %79 : vector<8xf32> to vector<8x1xf32>
    %81 = vector.broadcast %80 : vector<8x1xf32> to vector<8x8xf32>
    %82 = arith.subf %78, %81 : vector<8x8xf32>
    %83 = math.exp %82 : vector<8x8xf32>
    %cst_29 = arith.constant dense<0.000000e+00> : vector<8xf32>
    %84 = vector.multi_reduction <add>, %83, %cst_29 [1] : vector<8x8xf32> to vector<8xf32>
    %85 = vector.shape_cast %84 : vector<8xf32> to vector<8x1xf32>
    %86 = tpu.reciprocal %85 {approx = true} : vector<8x1xf32> -> vector<8x1xf32>
    %87 = vector.broadcast %86 : vector<8x1xf32> to vector<8x8xf32>
    %88 = arith.mulf %83, %87 : vector<8x8xf32>
    %89 = arith.truncf %88 : vector<8x8xf32> to vector<8x8xbf16>
    %cst_30 = arith.constant dense<0.000000e+00> : vector<8x8xf32>
    %90 = tpu.matmul %89, %76, %cst_30 {dimension_numbers = #tpu.dot_dimension_numbers<[1], [0], [0], [1], [0, 0, 1, 1], [], []>} : vector<8x8xbf16>, vector<8x8xbf16>, vector<8x8xf32> -> vector<8x8xf32>
    %91 = arith.truncf %90 : vector<8x8xf32> to vector<8x8xbf16>
    %92 = vector.extract_strided_slice %30 {offsets = [16, 0], sizes = [8, 32], strides = [1, 1]} : vector<32x32xbf16> to vector<8x32xbf16>
    %cst_31 = arith.constant dense<0.000000e+00> : vector<8x32xf32>
    %93 = tpu.matmul %91, %92, %cst_31 {dimension_numbers = #tpu.dot_dimension_numbers<[1], [0], [0], [1], [0, 0, 1, 1], [], []>} : vector<8x8xbf16>, vector<8x32xbf16>, vector<8x32xf32> -> vector<8x32xf32>
    %94 = arith.addf %73, %93 : vector<8x32xf32>
    %95 = vector.extract_strided_slice %24 {offsets = [0, 24], sizes = [8, 8], strides = [1, 1]} : vector<8x32xbf16> to vector<8x8xbf16>
    %96 = vector.extract_strided_slice %26 {offsets = [0, 24], sizes = [8, 8], strides = [1, 1]} : vector<8x32xbf16> to vector<8x8xbf16>
    %97 = vector.extract_strided_slice %28 {offsets = [0, 24], sizes = [8, 8], strides = [1, 1]} : vector<8x32xbf16> to vector<8x8xbf16>
    %cst_32 = arith.constant dense<0.000000e+00> : vector<8x8xf32>
    %98 = tpu.matmul %95, %96, %cst_32 {dimension_numbers = #tpu.dot_dimension_numbers<[1], [1], [0], [0], [0, 0, 1, 0], [], []>} : vector<8x8xbf16>, vector<8x8xbf16>, vector<8x8xf32> -> vector<8x8xf32>
    %99 = arith.addf %98, %29 : vector<8x8xf32>
    %cst_33 = arith.constant dense<0xFF800000> : vector<8xf32>
    %100 = vector.multi_reduction <maximumf>, %99, %cst_33 [1] : vector<8x8xf32> to vector<8xf32>
    %101 = vector.shape_cast %100 : vector<8xf32> to vector<8x1xf32>
    %102 = vector.broadcast %101 : vector<8x1xf32> to vector<8x8xf32>
    %103 = arith.subf %99, %102 : vector<8x8xf32>
    %104 = math.exp %103 : vector<8x8xf32>
    %cst_34 = arith.constant dense<0.000000e+00> : vector<8xf32>
    %105 = vector.multi_reduction <add>, %104, %cst_34 [1] : vector<8x8xf32> to vector<8xf32>
    %106 = vector.shape_cast %105 : vector<8xf32> to vector<8x1xf32>
    %107 = tpu.reciprocal %106 {approx = true} : vector<8x1xf32> -> vector<8x1xf32>
    %108 = vector.broadcast %107 : vector<8x1xf32> to vector<8x8xf32>
    %109 = arith.mulf %104, %108 : vector<8x8xf32>
    %110 = arith.truncf %109 : vector<8x8xf32> to vector<8x8xbf16>
    %cst_35 = arith.constant dense<0.000000e+00> : vector<8x8xf32>
    %111 = tpu.matmul %110, %97, %cst_35 {dimension_numbers = #tpu.dot_dimension_numbers<[1], [0], [0], [1], [0, 0, 1, 1], [], []>} : vector<8x8xbf16>, vector<8x8xbf16>, vector<8x8xf32> -> vector<8x8xf32>
    %112 = arith.truncf %111 : vector<8x8xf32> to vector<8x8xbf16>
    %113 = vector.extract_strided_slice %30 {offsets = [24, 0], sizes = [8, 32], strides = [1, 1]} : vector<32x32xbf16> to vector<8x32xbf16>
    %cst_36 = arith.constant dense<0.000000e+00> : vector<8x32xf32>
    %114 = tpu.matmul %112, %113, %cst_36 {dimension_numbers = #tpu.dot_dimension_numbers<[1], [0], [0], [1], [0, 0, 1, 1], [], []>} : vector<8x8xbf16>, vector<8x32xbf16>, vector<8x32xf32> -> vector<8x32xf32>
    %115 = arith.addf %94, %114 : vector<8x32xf32>
    %c0_37 = arith.constant 0 : index
    %c0_38 = arith.constant 0 : index
    %116 = vector.load %arg8[%c0_37, %c0_38] : memref<1x32xf32, #tpu.memory_space<vmem>>, vector<1x32xf32>
    %117 = vector.broadcast %116 : vector<1x32xf32> to vector<8x32xf32>
    %118 = arith.addf %115, %117 : vector<8x32xf32>
    %c0_39 = arith.constant 0 : index
    %c0_40 = arith.constant 0 : index
    %119 = vector.load %arg14[%c0_39, %c0_40] : memref<8x32xf32, #tpu.memory_space<vmem>>, vector<8x32xf32>
    tpu.vector_store %arg14[%c0_39, %c0_40], %118 {strides = array<i32>} : memref<8x32xf32, #tpu.memory_space<vmem>>, vector<8x32xf32>,
    %c0_41 = arith.constant 0 : index
    %c0_42 = arith.constant 0 : index
    %120 = vector.load %arg14[%c0_41, %c0_42] : memref<8x32xf32, #tpu.memory_space<vmem>>, vector<8x32xf32>
    %121 = arith.addf %1, %120 : vector<8x32xf32>
    %122 = arith.mulf %121, %121 : vector<8x32xf32>
    %cst_43 = arith.constant dense<0.000000e+00> : vector<8xf32>
    %123 = vector.multi_reduction <add>, %122, %cst_43 [1] : vector<8x32xf32> to vector<8xf32>
    %124 = vector.shape_cast %123 : vector<8xf32> to vector<8x1xf32>
    %cst_44 = arith.constant 3.200000e+01 : f32
    %125 = vector.broadcast %cst_44 : f32 to vector<8x1xf32>
    %126 = arith.divf %124, %125 : vector<8x1xf32>
    %cst_45 = arith.constant 9.99999997E-7 : f32
    %127 = vector.broadcast %cst_45 : f32 to vector<8x1xf32>
    %128 = arith.addf %126, %127 : vector<8x1xf32>
    %129 = math.rsqrt %128 : vector<8x1xf32>
    %130 = vector.broadcast %129 : vector<8x1xf32> to vector<8x32xf32>
    %131 = arith.mulf %121, %130 : vector<8x32xf32>
    %c0_46 = arith.constant 0 : index
    %c0_47 = arith.constant 0 : index
    %132 = vector.load %arg4[%c0_46, %c0_47] : memref<1x32xf32, #tpu.memory_space<vmem>>, vector<1x32xf32>
    %133 = vector.broadcast %132 : vector<1x32xf32> to vector<8x32xf32>
    %134 = arith.mulf %131, %133 : vector<8x32xf32>
    %135 = arith.truncf %134 : vector<8x32xf32> to vector<8x32xbf16>
    %c0_48 = arith.constant 0 : index
    %c0_49 = arith.constant 0 : index
    %136 = vector.load %arg9[%c0_48, %c0_49] : memref<32x128xbf16, #tpu.memory_space<vmem>>, vector<32x128xbf16>
    %cst_50 = arith.constant dense<0.000000e+00> : vector<8x128xf32>
    %137 = tpu.matmul %135, %136, %cst_50 {dimension_numbers = #tpu.dot_dimension_numbers<[1], [0], [0], [1], [0, 0, 1, 1], [], []>} : vector<8x32xbf16>, vector<32x128xbf16>, vector<8x128xf32> -> vector<8x128xf32>
    %c0_51 = arith.constant 0 : index
    %c0_52 = arith.constant 0 : index
    %138 = vector.load %arg10[%c0_51, %c0_52] : memref<1x128xf32, #tpu.memory_space<vmem>>, vector<1x128xf32>
    %139 = vector.broadcast %138 : vector<1x128xf32> to vector<8x128xf32>
    %140 = arith.addf %137, %139 : vector<8x128xf32>
    %cst_53 = arith.constant 0.000000e+00 : f32
    %141 = vector.broadcast %cst_53 : f32 to vector<8x128xf32>
    %142 = arith.maximumf %140, %141 : vector<8x128xf32>
    %143 = arith.truncf %142 : vector<8x128xf32> to vector<8x128xbf16>
    %c0_54 = arith.constant 0 : index
    %c0_55 = arith.constant 0 : index
    %144 = vector.load %arg11[%c0_54, %c0_55] : memref<128x32xbf16, #tpu.memory_space<vmem>>, vector<128x32xbf16>
    %cst_56 = arith.constant dense<0.000000e+00> : vector<8x32xf32>
    %145 = tpu.matmul %143, %144, %cst_56 {dimension_numbers = #tpu.dot_dimension_numbers<[1], [0], [0], [1], [0, 0, 1, 1], [], []>} : vector<8x128xbf16>, vector<128x32xbf16>, vector<8x32xf32> -> vector<8x32xf32>
    %c0_57 = arith.constant 0 : index
    %c0_58 = arith.constant 0 : index
    %146 = vector.load %arg12[%c0_57, %c0_58] : memref<1x32xf32, #tpu.memory_space<vmem>>, vector<1x32xf32>
    %147 = vector.broadcast %146 : vector<1x32xf32> to vector<8x32xf32>
    %148 = arith.addf %145, %147 : vector<8x32xf32>
    %149 = arith.addf %121, %148 : vector<8x32xf32>
    %150 = vector.shape_cast %149 : vector<8x32xf32> to vector<1x8x32xf32>
    %c0_59 = arith.constant 0 : index
    %c0_60 = arith.constant 0 : index
    %c0_61 = arith.constant 0 : index
    %151 = vector.load %arg13[%c0_59, %c0_60, %c0_61] : memref<1x8x32xf32, #tpu.memory_space<vmem>>, vector<1x8x32xf32>
    tpu.vector_store %arg13[%c0_59, %c0_60, %c0_61], %150 {strides = array<i32>} : memref<1x8x32xf32, #tpu.memory_space<vmem>>, vector<1x8x32xf32>,
    return
  }
  func.func @transform_0(%arg0: i32) -> (i32, i32, i32) {
    %c0_i32 = arith.constant 0 : i32
    %c0_i32_0 = arith.constant 0 : i32
    %c0_i32_1 = arith.constant 0 : i32
    return %arg0, %c0_i32, %c0_i32_0 : i32, i32, i32
  }
  func.func @transform_1(%arg0: i32) -> (i32, i32) {
    %c0_i32 = arith.constant 0 : i32
    %c0_i32_0 = arith.constant 0 : i32
    %c0_i32_1 = arith.constant 0 : i32
    return %c0_i32, %c0_i32_0 : i32, i32
  }
  func.func @transform_2(%arg0: i32) -> (i32, i32) {
    %c0_i32 = arith.constant 0 : i32
    %c0_i32_0 = arith.constant 0 : i32
    %c0_i32_1 = arith.constant 0 : i32
    return %c0_i32, %c0_i32_0 : i32, i32
  }
  func.func @transform_3(%arg0: i32) -> (i32, i32) {
    %c0_i32 = arith.constant 0 : i32
    %c0_i32_0 = arith.constant 0 : i32
    %c0_i32_1 = arith.constant 0 : i32
    return %c0_i32, %c0_i32_0 : i32, i32
  }
  func.func @transform_4(%arg0: i32) -> (i32, i32) {
    %c0_i32 = arith.constant 0 : i32
    %c0_i32_0 = arith.constant 0 : i32
    %c0_i32_1 = arith.constant 0 : i32
    return %c0_i32, %c0_i32_0 : i32, i32
  }
  func.func @transform_5(%arg0: i32) -> (i32, i32) {
    %c0_i32 = arith.constant 0 : i32
    %c0_i32_0 = arith.constant 0 : i32
    %c0_i32_1 = arith.constant 0 : i32
    return %c0_i32, %c0_i32_0 : i32, i32
  }
  func.func @transform_6(%arg0: i32) -> (i32, i32) {
    %c0_i32 = arith.constant 0 : i32
    %c0_i32_0 = arith.constant 0 : i32
    %c0_i32_1 = arith.constant 0 : i32
    return %c0_i32, %c0_i32_0 : i32, i32
  }
  func.func @transform_7(%arg0: i32) -> (i32, i32) {
    %c0_i32 = arith.constant 0 : i32
    %c0_i32_0 = arith.constant 0 : i32
    %c0_i32_1 = arith.constant 0 : i32
    return %c0_i32, %c0_i32_0 : i32, i32
  }
  func.func @transform_8(%arg0: i32) -> (i32, i32) {
    %c0_i32 = arith.constant 0 : i32
    %c0_i32_0 = arith.constant 0 : i32
    %c0_i32_1 = arith.constant 0 : i32
    return %c0_i32, %c0_i32_0 : i32, i32
  }
  func.func @transform_9(%arg0: i32) -> (i32, i32) {
    %c0_i32 = arith.constant 0 : i32
    %c0_i32_0 = arith.constant 0 : i32
    %c0_i32_1 = arith.constant 0 : i32
    return %c0_i32, %c0_i32_0 : i32, i32
  }
  func.func @transform_10(%arg0: i32) -> (i32, i32) {
    %c0_i32 = arith.constant 0 : i32
    %c0_i32_0 = arith.constant 0 : i32
    %c0_i32_1 = arith.constant 0 : i32
    return %c0_i32, %c0_i32_0 : i32, i32
  }
  func.func @transform_11(%arg0: i32) -> (i32, i32) {
    %c0_i32 = arith.constant 0 : i32
    %c0_i32_0 = arith.constant 0 : i32
    %c0_i32_1 = arith.constant 0 : i32
    return %c0_i32, %c0_i32_0 : i32, i32
  }
  func.func @transform_12(%arg0: i32) -> (i32, i32, i32) {
    %c0_i32 = arith.constant 0 : i32
    %c0_i32_0 = arith.constant 0 : i32
    %c0_i32_1 = arith.constant 0 : i32
    return %arg0, %c0_i32, %c0_i32_0 : i32, i32, i32
  }
}

</mosaic_0001>

<bundles_post_ra>
// kernel: tpu_custom_call.1
= control target key start
LH: loop header
LB: loop body
LE: loop exit
PB: predicated region body
PF: predicated region fallthrough
CT: control target
= control target key end

     0   :  { %s2126_s0 = inlined_call_operand.vmem [shape: f32[2,8,32], index: 0, kind: input, shape index: {}]   ;;  %s2127_s1 = inlined_call_operand.vmem [shape: f32[8,8], index: 1, kind: input, shape index: {}]   ;;  %s2128_s2 = inlined_call_operand.vmem [shape: f32[1,32], index: 2, kind: input, shape index: {}]   ;;  %s2129_s3 = inlined_call_operand.vmem [shape: f32[1,32], index: 3, kind: input, shape index: {}]   ;;  %s2130_s4 = inlined_call_operand.vmem [shape: bf16[32,96], index: 4, kind: input, shape index: {}]   ;;  %s2131_s5 = inlined_call_operand.vmem [shape: f32[1,96], index: 5, kind: input, shape index: {}]   ;;  %s2132_s6 = inlined_call_operand.vmem [shape: bf16[32,32], index: 6, kind: input, shape index: {}]   ;;  %s2133_s7 = inlined_call_operand.vmem [shape: f32[1,32], index: 7, kind: input, shape index: {}]   ;;  %s2134_s8 = inlined_call_operand.vmem [shape: bf16[32,128], index: 8, kind: input, shape index: {}]   ;;  %s2135_s9 = inlined_call_operand.vmem [shape: f32[1,128], index: 9, kind: input, shape index: {}]   ;;  %s2136_s10 = inlined_call_operand.vmem [shape: bf16[128,32], index: 10, kind: input, shape index: {}]   ;;  %s2137_s11 = inlined_call_operand.vmem [shape: f32[1,32], index: 11, kind: input, shape index: {}]   ;;  %s2138_s12 = inlined_call_operand.hbm [shape: f32[2,8,32], index: 12, kind: output, shape index: {}]  }
   0x1   :  { %2139 = sst [smem:[#allocation6_spill]] %s2126_s0 }
   0x2   :  { %2140 = sst [smem:[#allocation7_spill]] %s2127_s1 }
   0x3   :  { %17 = vsyncpa [#allocation4], 0 }
   0x4   :  { %19 = vsyncpa [#allocation4 + $0x1], 0  ;;  %s1832_s21 = smov 0   ;;  %s1834_s22 = smov 0  }
   0x5   :  { %s1836_s23 = smov 0   ;;  %s1838_s24 = smov 0  }
   0x6 LB: > { %s1853_s25 = sadd.s32 4294967295, %s1751_s24   ;;  %s1418_s26 = sadd.s32 4294967294, %s1751_s24   ;;  %s1751_s24 = sphi %s1838_s24, %s2148_s24   ;;  %s1747_s23 = sphi %s1836_s23, %s2147_s23   ;;  %s1743_s22 = sphi %s1834_s22, %s2146_s22   ;;  %s1739_s21 = sphi %s1832_s21, %s2145_s21  }
   0x7   : > { %s1857_s27 = sadd.s32 1, %s1751_s24   ;;  %s289_s28 = sadd.s32 1, %s1747_s23 }
   0x8   : > { %s286_s29 = ssub.s32 %s1751_s24, %s1857_s27  ;;  %p299_p0 = scmp.ne.s32.totalorder %s1747_s23, %s1743_s22 }
   0x9   : > { %p287_p1 = scmp.eq.s32.totalorder %s286_s29, 0  ;;  %p300_p2 = scmp.eq.s32.totalorder %s1853_s25, 1 }
   0xa   : > { %p305_p3 = scmp.ne.s32.totalorder %s1743_s22, %s1739_s21  ;;  %p306_p4 = scmp.eq.s32.totalorder %s1418_s26, 1 }
   0xb   : > { %s1868_s30 = scalar_select %p287_p1, %s1747_s23, %s289_s28  }
   0xc   : > { %p1870_p5 = por %p300_p2, %p299_p0  ;;  %p1874_p6 = por %p306_p4, %p305_p3 }
   0xd   : > { %p1421_p7 = scmp.ge.s32.totalorder %s1751_s24, 1  ;;  %p364_p8 = scmp.lt.s32.totalorder %s1751_s24, 3 }
   0xf   : > { %p365_p9 = pnand %p1421_p7, %p364_p8 }
  0x10   : > { %p405_p10 = scmp.lt.s32.totalorder (!%p365_p9), %s1853_s25, 1  ;;  %s2143_s0 = sld [smem:[#allocation6_spill]] (!%p365_p9) }
  0x11   : > { %368 = sbr.rel (%p365_p9) target bundleno = 3744 (0xea0), region = 68  ;;  %s1756_s20 = smov (!%p365_p9), 120  }
  0x12   : > { %s2144_s1 = sld [smem:[#allocation7_spill]] (!%p365_p9)  ;;  %s1757_s29 = smov (!%p365_p9), 64  }
  0x13   : > { %s1760_s17 = smov (!%p365_p9), 112   ;;  %s1761_s18 = smov (!%p365_p9), 56  }
  0x14   : > { %s402_s26 = sand.u32 (!%p365_p9), 1, %s1743_s22  }
  0x15   : > { %s1422_s28 = sshll.u32 (!%p365_p9), %s402_s26, 3 }
  0x16   : > { %s406_s15 = scalar_select %p405_p10, %s1853_s25, 1  ;;  %vm412_vm0 = vcmask 261120   ;;  %v1659_v3 = vld [vmem:[%s2130_s4 + $0x8] sm:$0xff]   ;;  %v1753_v4 = vmov 0.0   ;;  %vm1754_vm1 = vmmov 0   ;;  %v1660_v5 = vld [vmem:[%s2130_s4] sm:$0xff]  }
  0x17   : > { %1499 = vmatprep.subr.bf16.mxu1 %v1753_v4  ;;  %1503 = vmatprep.mubr.msk.bf16.mxu1 %vm1754_vm1, %v1753_v4  ;;  %v1424_v10 = vld [vmem:[%s2128_s2] ss:$0 sm:$0xff]  ;;  %vm507_vm2 = vcmask 64512   ;;  %vm571_vm3 = vcmask 1043456   ;;  %v501_v61 = vld [vmem:[%s2132_s6 + $0x4] sm:$0xf] }
  0x18   : > { %s1423_s16 = sshll.u32 %s406_s15, 3  ;;  %1500 = vmatpush3.bf16.msra.mxu1 %v1659_v3  ;;  %1525 = vmatprep.subr.bf16.mxu0 %v1753_v4  ;;  %v1425_v14 = vld [vmem:[%s2131_s5] ss:$0 sm:$0xff]  ;;  %s1758_s15 = smov 88   ;;  %v732_v62 = vsel %vm571_vm3, %v501_v61, 0 }
  0x19   : > { %s408_s19 = scalar_lea.vmem %s2143_s0, %s1423_s16  ;;  %1501 = vmatprep.subr.bf16.mxu1 %v1753_v4  ;;  %1527 = vmatprep.mubr.msk.bf16.mxu0 %vm1754_vm1, %v1753_v4  ;;  %v1929_v25 = vld [vmem:[%s2144_s1] sm:$0xff]  ;;  %s1759_s16 = smov 80  }
  0x1a   : > { %v1885_v0 = vld [vmem:[%s408_s19] sm:$0xff]  ;;  %s1755_s19 = smov 96  }
  0x1b   : > { %v411_v1 = vmul.f32 %v1885_v0, %v1885_v0 }
  0x1c   : > { %1502 = vmatpush3.bf16.msra.mxu1 %v1660_v5  ;;  %v500_v5 = vld [vmem:[%s2132_s6] sm:$0xf] }
  0x1d   : > { %v413_v2 = vsel %vm412_vm0, %v411_v1, 0.0  ;;  %1507 = vmatprep.subr.bf16.mxu1 %v1753_v4 }
  0x1e   : > { %414 = vadd.xlane.f32.xlu0 %v413_v2 }
  0xa7   : > { %v415_v6 = vpop.xlane.xlu0 %414 }
  0xa8   : > { %v417_v7 = vmul.f32 0.03125, %v415_v6 }
  0xaa   : > { %v418_v8 = vadd.f32 1e-06, %v417_v7 }
  0xac   : > { %1671 = vrsqrt.f32 %v418_v8  ;;  %v778_v8 = vsel %vm571_vm3, %v500_v5, 0 }
  0xb9   : > { %v1672_v9 = vpop.eup %1671 }
  0xba   : > { %v420_v11 = vmul.f32 %v1672_v9, %v1885_v0 }
  0xbc   : > { %v428_v12 = vmul.f32 %v1424_v10, %v420_v11 }
  0xbe   : > { %v429_v13 = vpack.c.bf16 %v428_v12, %v428_v12 }
  0xc0   : > { %1504 = vmatmul.mubr.msk.bf16.vlgmr.msra.gmra.mxu1 %vm412_vm0, %v429_v13 }
  0xc1   : > { %1509 = vmatprep.mubr.msk.bf16.mxu1 %vm1754_vm1, %v1753_v4 }
 0x180   : > { %v490_v15 = vpop.f32.mrf.mxu1 }
 0x181   : > { %v491_v16 = vadd.f32 %v1425_v14, %v490_v15 }
 0x182   : > { %v1505_v17 = vpop.f32.mrf.mxu1 }
 0x183   : > { %v496_v18 = vmul.f32 0.35355338, %v491_v16  ;;  %v1914_v19 = vpack.c.bf16 %v491_v16, %v491_v16 }
 0x184   : > { %v493_v20 = vpop.f32.mrf.mxu1 }
 0x185   : > { %505 = vrot.lane.b32.xlu0 %v1914_v19, %s1755_s19  ;;  %v1917_v22 = vpack.c.bf16 %v496_v18, %v496_v18  ;;  %s1765_s19 = smov 40  }
 0x186   : > { %v1506_v21 = vpop.f32.mrf.mxu1 }
 0x189   : > { %617 = vrot.lane.b32.xlu0 %v1917_v22, %s1756_s20 }
 0x1f7   : > { %v506_v23 = vpop.permute.xlu0 %505 }
 0x1f8   : > { %v512_v24 = vsel %vm507_vm2, %v506_v23, 0 }
 0x1f9   : > { %1508 = vmatpush3.bf16.xpose.msra.mxu1 %v512_v24 }
 0x1fa   : > { %1513 = vmatprep.subr.bf16.mxu1 %v1753_v4 }
 0x1fb   : > { %v618_v45 = vpop.permute.xlu0 %617 }
 0x200   : > { %1510 = vmatmul.mubr.msk.bf16.vlgmr.msra.gmra.mxu1 %vm507_vm2, %v1917_v22 }
 0x201   : > { %1515 = vmatprep.mubr.msk.bf16.mxu1 %vm1754_vm1, %v1753_v4 }
 0x2c0   : > { %v548_v26 = vpop.f32.mrf.mxu1 }
 0x2c1   : > { %v549_v27 = vadd.f32 %v548_v26, %v1929_v25 }
 0x2c2   : > { %v1511_v28 = vpop.f32.mrf.mxu1 }
 0x2c3   : > { %v554_v29 = vsel %vm507_vm2, %v549_v27, -inf }
 0x2c4   : > { %555 = vmax.xlane.f32.xlu1 %v554_v29  ;;  %v551_v30 = vpop.f32.mrf.mxu1 }
 0x2c6   : > { %v1512_v31 = vpop.f32.mrf.mxu1 }
 0x2d5   : > { %566 = vrot.lane.b32.xlu1 %v1914_v19, %s1757_s29  ;;  %s1762_s29 = smov 48  }
 0x34d   : > { %v556_v32 = vpop.xlane.xlu1 %555 }
 0x34e   : > { %v557_v33 = vsub.f32 %v549_v27, %v556_v32 }
 0x350   : > { %v558_v34 = vmul.f32 1.442695, %v557_v33 }
 0x351   : > { %v567_v35 = vpop.permute.xlu1 %566 }
 0x352   : > { %1673 = vpow2.f32 %v558_v34  ;;  %v573_v36 = vsel %vm571_vm3, %v567_v35, 0 }
 0x353   : > { %1514 = vmatpush3.bf16.msra.mxu1 %v573_v36 }
 0x354   : > { %1519 = vmatprep.subr.bf16.mxu1 %v1753_v4 }
 0x35f   : > { %v1674_v37 = vpop.eup %1673 }
 0x360   : > { %v560_v38 = vsel %vm507_vm2, %v1674_v37, 0.0 }
 0x361   : > { %561 = vadd.xlane.f32.xlu1 %v560_v38 }
 0x372   : > { %619 = vrot.lane.b32.xlu1 %v1914_v19, %s1758_s15  ;;  %s1763_s15 = smov 104  }
 0x3ea   : > { %v562_v39 = vpop.xlane.xlu1 %561 }
 0x3eb   : > { %1675 = vrcp.f32 %v562_v39 }
 0x3ee   : > { %v620_v42 = vpop.permute.xlu1 %619 }
 0x3ef   : > { %v625_v44 = vsel %vm507_vm2, %v620_v42, 0 }
 0x3f8   : > { %v1676_v40 = vpop.eup %1675 }
 0x3f9   : > { %v564_v41 = vmul.f32 %v1676_v40, %v1674_v37 }
 0x3fb   : > { %v565_v43 = vpack.c.bf16 %v564_v41, %v564_v41 }
 0x3fd   : > { %1516 = vmatmul.mubr.msk.bf16.vlgmr.msra.gmra.mxu1 %vm507_vm2, %v565_v43 }
 0x3fe   : > { %1520 = vmatpush3.bf16.xpose.msra.mxu1 %v625_v44  ;;  %1521 = vmatprep.mubr.msk.bf16.mxu1 %vm1754_vm1, %v1753_v4 }
 0x3ff   : > { %1531 = vmatprep.subr.bf16.mxu1 %v1753_v4 }
 0x405   : > { %1522 = vmatmul.mubr.msk.bf16.vlgmr.msra.gmra.mxu1 %vm507_vm2, %v618_v45 }
 0x406   : > { %1533 = vmatprep.mubr.msk.bf16.mxu1 %vm1754_vm1, %v1753_v4  ;;  %1532 = vmatpush3.bf16.msra.mxu1 %v732_v62 }
 0x407   : > { %1543 = vmatprep.subr.bf16.mxu1 %v1753_v4 }
 0x4bd   : > { %v609_v46 = vpop.f32.mrf.mxu1 }
 0x4be   : > { %v615_v9 = vpack.c.bf16 %v609_v46, %v609_v46 }
 0x4bf   : > { %v1517_v47 = vpop.f32.mrf.mxu1 }
 0x4c1   : > { %v612_v48 = vpop.f32.mrf.mxu1 }
 0x4c2   : > { %v502_v48 = vld [vmem:[%s2132_s6 + $0x8] sm:$0xf] }
 0x4c3   : > { %v1518_v49 = vpop.f32.mrf.mxu1 }
 0x4c4   : > { %v935_v49 = vsel %vm571_vm3, %v502_v48, 0 }
 0x4c5   : > { %v661_v50 = vpop.f32.mrf.mxu1 }
 0x4c6   : > { %v662_v51 = vadd.f32 %v661_v50, %v1929_v25 }
 0x4c7   : > { %v1523_v52 = vpop.f32.mrf.mxu1 }
 0x4c8   : > { %v667_v53 = vsel %vm507_vm2, %v662_v51, -inf }
 0x4c9   : > { %668 = vmax.xlane.f32.xlu1 %v667_v53  ;;  %v664_v54 = vpop.f32.mrf.mxu1 }
 0x4cb   : > { %v1524_v55 = vpop.f32.mrf.mxu1 }
 0x4da   : > { %822 = vrot.lane.b32.xlu1 %v1914_v19, %s1759_s16  ;;  %s1764_s16 = smov 72  }
 0x4de   : > { %820 = vrot.lane.b32.xlu1 %v1917_v22, %s1760_s17  ;;  %s404_s17 = scalar_lea.vmem [#allocation3], %s1422_s28 }
 0x552   : > { %v669_v56 = vpop.xlane.xlu1 %668 }
 0x553   : > { %v670_v57 = vsub.f32 %v662_v51, %v669_v56 }
 0x555   : > { %v671_v58 = vmul.f32 1.442695, %v670_v57 }
 0x556   : > { %v823_v10 = vpop.permute.xlu1 %822 }
 0x557   : > { %1677 = vpow2.f32 %v671_v58  ;;  %v828_v14 = vsel %vm507_vm2, %v823_v10, 0 }
 0x55a   : > { %v821_v18 = vpop.permute.xlu1 %820 }
 0x564   : > { %v1678_v59 = vpop.eup %1677 }
 0x565   : > { %v673_v60 = vsel %vm507_vm2, %v1678_v59, 0.0 }
 0x566   : > { %674 = vadd.xlane.f32.xlu0 %v673_v60 }
 0x57c   : > { %679 = vrot.lane.b32.xlu0 %v1914_v19, %s1761_s18  ;;  %s1359_s18 = sshll.u32 %s404_s17, 4  ;;  %s2086_s18 = int_to_ptr.vmem [resolvable:$true] %s1359_s18 }
 0x57d   : > { %s1691_s28 = scalar_lea.vmem %s2086_s18, 128 }
 0x57e   : > { %p1692_p11 = scmp.ne.s32.totalorder %s2086_s18, %s1691_s28 }
 0x580   : > { %p1693_p12 = pnand %p1692_p11, %p1870_p5 }
 0x582   : > { %p1694_p13 = pneg %p1693_p12 }
 0x5ef   : > { %v675_v63 = vpop.xlane.xlu0 %674 }
 0x5f0   : > { %1679 = vrcp.f32 %v675_v63 }
 0x5f3   : > { %v680_v1 = vpop.permute.xlu0 %679 }
 0x5f4   : > { %v685_v2 = vsel %vm571_vm3, %v680_v1, 0 }
 0x5f5   : > { %1526 = vmatpush3.bf16.msra.mxu0 %v685_v2 }
 0x5f6   : > { %1537 = vmatprep.subr.bf16.mxu0 %v1753_v4 }
 0x5fd   : > { %v1680_v3 = vpop.eup %1679 }
 0x5fe   : > { %v677_v6 = vmul.f32 %v1680_v3, %v1678_v59 }
 0x600   : > { %v678_v7 = vpack.c.bf16 %v677_v6, %v677_v6 }
 0x602   : > { %1528 = vmatmul.mubr.msk.bf16.vlgmr.msra.gmra.mxu0 %vm507_vm2, %v678_v7  ;;  %v503_v7 = vld [vmem:[%s2132_s6 + $0xc] sm:$0xf] }
 0x603   : > { %1538 = vmatpush3.bf16.msra.mxu0 %v778_v8  ;;  %1539 = vmatprep.mubr.msk.bf16.mxu0 %vm1754_vm1, %v1753_v4  ;;  %v1093_v8 = vsel %vm571_vm3, %v503_v7, 0 }
 0x604   : > { %1549 = vmatprep.subr.bf16.mxu0 %v1753_v4 }
 0x60a   : > { %1540 = vmatmul.mubr.msk.bf16.vlgmr.msra.gmra.mxu0 %vm507_vm2, %v615_v9 }
 0x60b   : > { %1551 = vmatprep.mubr.msk.bf16.mxu0 %vm1754_vm1, %v1753_v4 }
 0x6c2   : > { %v721_v11 = vpop.f32.mrf.mxu0 }
 0x6c3   : > { %v727_v12 = vpack.c.bf16 %v721_v11, %v721_v11 }
 0x6c4   : > { %v1529_v13 = vpop.f32.mrf.mxu0 }
 0x6c5   : > { %1534 = vmatmul.mubr.msk.bf16.vlgmr.msra.gmra.mxu1 %vm507_vm2, %v727_v12 }
 0x6c6   : > { %1544 = vmatpush3.bf16.xpose.msra.mxu1 %v828_v14  ;;  %v724_v15 = vpop.f32.mrf.mxu0  ;;  %1545 = vmatprep.mubr.msk.bf16.mxu1 %vm1754_vm1, %v1753_v4 }
 0x6c7   : > { %1555 = vmatprep.subr.bf16.mxu1 %v1753_v4 }
 0x6c8   : > { %v1530_v16 = vpop.f32.mrf.mxu0 }
 0x6ca   : > { %v1975_v17 = vpop.f32.mrf.mxu0 }
 0x6cc   : > { %v1541_v20 = vpop.f32.mrf.mxu0 }
 0x6cd   : > { %1546 = vmatmul.mubr.msk.bf16.vlgmr.msra.gmra.mxu1 %vm507_vm2, %v821_v18 }
 0x6ce   : > { %v817_v21 = vpop.f32.mrf.mxu0  ;;  %1557 = vmatprep.mubr.msk.bf16.mxu1 %vm1754_vm1, %v1753_v4  ;;  %1556 = vmatpush3.bf16.msra.mxu1 %v935_v49  ;;  %v1669_v49 = vld [vmem:[%s2136_s10 + $0x8] sm:$0xff]  }
 0x6cf   : > { %1567 = vmatprep.subr.bf16.mxu1 %v1753_v4 }
 0x6d0   : > { %v1542_v23 = vpop.f32.mrf.mxu0 }
 0x785   : > { %v1980_v24 = vpop.f32.mrf.mxu1 }
 0x787   : > { %v1535_v26 = vpop.f32.mrf.mxu1 }
 0x789   : > { %v771_v27 = vpop.f32.mrf.mxu1 }
 0x78b   : > { %v1536_v28 = vpop.f32.mrf.mxu1 }
 0x78d   : > { %v864_v29 = vpop.f32.mrf.mxu1 }
 0x78e   : > { %v865_v30 = vadd.f32 %v864_v29, %v1929_v25 }
 0x78f   : > { %v1547_v31 = vpop.f32.mrf.mxu1 }
 0x790   : > { %v870_v32 = vsel %vm507_vm2, %v865_v30, -inf }
 0x791   : > { %871 = vmax.xlane.f32.xlu0 %v870_v32  ;;  %v867_v33 = vpop.f32.mrf.mxu1 }
 0x793   : > { %v1548_v34 = vpop.f32.mrf.mxu1 }
 0x7a7   : > { %882 = vrot.lane.b32.xlu0 %v1914_v19, %s1762_s29  ;;  %s1766_s29 = smov [#allocation3]  }
 0x7ab   : > { %978 = vrot.lane.b32.xlu0 %v1917_v22, %s1763_s15  ;;  %s1695_s15 = sshll.u32 %s1766_s29, 4  ;;  %s1696_s15 = int_to_ptr.vmem [resolvable:$false] %s1695_s15 }
 0x7ac   : > { %p1698_p0 = scmp.lt.s32.totalorder %s2086_s18, %s1696_s15 }
 0x81a   : > { %v872_v35 = vpop.xlane.xlu0 %871 }
 0x81b   : > { %v873_v36 = vsub.f32 %v865_v30, %v872_v35  ;;  %v1661_v35 = vld [vmem:[%s2134_s8 + $0x8] sm:$0xff]  }
 0x81d   : > { %v874_v37 = vmul.f32 1.442695, %v873_v36  ;;  %v1662_v36 = vld [vmem:[%s2134_s8] sm:$0xff]  }
 0x81e   : > { %v883_v38 = vpop.permute.xlu0 %882 }
 0x81f   : > { %1681 = vpow2.f32 %v874_v37  ;;  %v888_v39 = vsel %vm571_vm3, %v883_v38, 0  ;;  %v1664_v37 = vld [vmem:[%s2136_s10 + $0x30] sm:$0xff]   ;;  %v1665_v38 = vld [vmem:[%s2136_s10 + $0x28] sm:$0xff]  }
 0x820   : > { %1550 = vmatpush3.bf16.msra.mxu0 %v888_v39  ;;  %v1666_v39 = vld [vmem:[%s2136_s10 + $0x20] sm:$0xff]  }
 0x821   : > { %1561 = vmatprep.subr.bf16.mxu0 %v1753_v4 }
 0x822   : > { %v979_v47 = vpop.permute.xlu0 %978 }
 0x82c   : > { %v1682_v40 = vpop.eup %1681 }
 0x82d   : > { %v876_v41 = vsel %vm507_vm2, %v1682_v40, 0.0 }
 0x82e   : > { %877 = vadd.xlane.f32.xlu1 %v876_v41  ;;  %v1668_v41 = vld [vmem:[%s2136_s10 + $0x10] sm:$0xff]  }
 0x83f   : > { %980 = vrot.lane.b32.xlu1 %v1914_v19, %s1764_s16  ;;  %s1457_s16 = sshll.u32 %s1853_s25, 7  ;;  %s1346_s25 = scalar_lea.sflag [#allocation4], %s402_s26 }
 0x840   : > { %s2084_s0 = scalar_lea.hbm %s2138_s12, %s1457_s16  ;;  %s1697_s16 = scalar_lea.vmem %s1696_s15, 256 }
 0x841   : > { %p1699_p1 = scmp.lt.s32.totalorder %s1697_s16, %s1691_s28 }
 0x843   : > { %p1700_p2 = por %p1699_p1, %p1698_p0 }
 0x845   : > { %p1701_p3 = pnand %p1700_p2, %p1694_p13 }
 0x8b7   : > { %v878_v42 = vpop.xlane.xlu1 %877 }
 0x8b8   : > { %1683 = vrcp.f32 %v878_v42 }
 0x8bb   : > { %v981_v44 = vpop.permute.xlu1 %980 }
 0x8bc   : > { %v986_v46 = vsel %vm507_vm2, %v981_v44, 0 }
 0x8c5   : > { %v1684_v22 = vpop.eup %1683 }
 0x8c6   : > { %v880_v43 = vmul.f32 %v1684_v22, %v1682_v40  ;;  %v1667_v40 = vld [vmem:[%s2136_s10 + $0x18] sm:$0xff]  }
 0x8c8   : > { %v881_v45 = vpack.c.bf16 %v880_v43, %v880_v43 }
 0x8ca   : > { %1552 = vmatmul.mubr.msk.bf16.vlgmr.msra.gmra.mxu0 %vm507_vm2, %v881_v45  ;;  %v1442_v45 = vld [vmem:[%s2129_s3] ss:$0 sm:$0xff] }
 0x8cb   : > { %1562 = vmatpush3.bf16.xpose.msra.mxu0 %v986_v46  ;;  %1563 = vmatprep.mubr.msk.bf16.mxu0 %vm1754_vm1, %v1753_v4 }
 0x8cc   : > { %1573 = vmatprep.subr.bf16.mxu0 %v1753_v4 }
 0x8d2   : > { %1564 = vmatmul.mubr.msk.bf16.vlgmr.msra.gmra.mxu0 %vm507_vm2, %v979_v47 }
 0x8d3   : > { %1575 = vmatprep.mubr.msk.bf16.mxu0 %vm1754_vm1, %v1753_v4  ;;  %1574 = vmatpush3.bf16.msra.mxu0 %v1093_v8 }
 0x8d4   : > { %1587 = vmatprep.subr.bf16.mxu0 %v1753_v4 }
 0x98a   : > { %v924_v50 = vpop.f32.mrf.mxu0 }
 0x98b   : > { %v930_v51 = vpack.c.bf16 %v924_v50, %v924_v50  ;;  %v1670_v50 = vld [vmem:[%s2136_s10] sm:$0xff]  }
 0x98c   : > { %v1553_v52 = vpop.f32.mrf.mxu0 }
 0x98d   : > { %1558 = vmatmul.mubr.msk.bf16.vlgmr.msra.gmra.mxu1 %vm507_vm2, %v930_v51  ;;  %v1443_v51 = vld [vmem:[%s2135_s9] ss:$0 sm:$0xff] }
 0x98e   : > { %v927_v53 = vpop.f32.mrf.mxu0  ;;  %1569 = vmatprep.mubr.msk.bf16.mxu1 %vm1754_vm1, %v1753_v4 }
 0x990   : > { %v1554_v54 = vpop.f32.mrf.mxu0 }
 0x992   : > { %v1022_v55 = vpop.f32.mrf.mxu0 }
 0x993   : > { %v1023_v56 = vadd.f32 %v1022_v55, %v1929_v25  ;;  %v815_v25 = vadd.f32 %v1975_v17, %v1980_v24  ;;  %v1441_v24 = vld [vmem:[%s2133_s7] ss:$0 sm:$0xff] }
 0x994   : > { %v1565_v57 = vpop.f32.mrf.mxu0 }
 0x995   : > { %v1028_v58 = vsel %vm507_vm2, %v1023_v56, -inf }
 0x996   : > { %1029 = vmax.xlane.f32.xlu1 %v1028_v58  ;;  %v1025_v59 = vpop.f32.mrf.mxu0 }
 0x998   : > { %v1566_v60 = vpop.f32.mrf.mxu0 }
 0xa1f   : > { %v1030_v61 = vpop.xlane.xlu1 %1029 }
 0xa20   : > { %v1031_v62 = vsub.f32 %v1023_v56, %v1030_v61 }
 0xa22   : > { %v1032_v63 = vmul.f32 1.442695, %v1031_v62 }
 0xa24   : > { %1685 = vpow2.f32 %v1032_v63 }
 0xa31   : > { %v1686_v1 = vpop.eup %1685 }
 0xa32   : > { %v1034_v2 = vsel %vm507_vm2, %v1686_v1, 0.0 }
 0xa33   : > { %1035 = vadd.xlane.f32.xlu0 %v1034_v2 }
 0xa49   : > { %1040 = vrot.lane.b32.xlu0 %v1914_v19, %s1765_s19 }
 0xa4d   : > { %v971_v3 = vpop.f32.mrf.mxu1 }
 0xa4e   : > { %v977_v5 = vadd.f32 %v971_v3, %v815_v25 }
 0xa4f   : > { %v1559_v6 = vpop.f32.mrf.mxu1 }
 0xa51   : > { %v974_v9 = vpop.f32.mrf.mxu1 }
 0xa53   : > { %v1560_v10 = vpop.f32.mrf.mxu1 }
 0xabc   : > { %v1036_v11 = vpop.xlane.xlu0 %1035 }
 0xabd   : > { %1687 = vrcp.f32 %v1036_v11 }
 0xac0   : > { %v1041_v19 = vpop.permute.xlu0 %1040 }
 0xac1   : > { %v1046_v12 = vsel %vm571_vm3, %v1041_v19, 0 }
 0xac2   : > { %1568 = vmatpush3.bf16.msra.mxu1 %v1046_v12 }
 0xac3   : > { %1579 = vmatprep.subr.bf16.mxu1 %v1753_v4 }
 0xaca   : > { %v1688_v13 = vpop.eup %1687 }
 0xacb   : > { %v1038_v14 = vmul.f32 %v1688_v13, %v1686_v1 }
 0xacd   : > { %v1039_v15 = vpack.c.bf16 %v1038_v14, %v1038_v14 }
 0xacf   : > { %1570 = vmatmul.mubr.msk.bf16.vlgmr.msra.gmra.mxu1 %vm507_vm2, %v1039_v15 }
 0xad0   : > { %1583 = vmatprep.mubr.msk.bf16.mxu1 %vm1754_vm1, %v1753_v4  ;;  %1580 = vmatpush3.bf16.msra.mxu1 %v1661_v35 }
 0xad1   : > { %1581 = vmatprep.subr.bf16.mxu1 %v1753_v4 }
 0xad4   : > { %1582 = vmatpush3.bf16.msra.mxu1 %v1662_v36 }
 0xb8f   : > { %v1082_v16 = vpop.f32.mrf.mxu1 }
 0xb90   : > { %v1088_v17 = vpack.c.bf16 %v1082_v16, %v1082_v16 }
 0xb91   : > { %v1571_v18 = vpop.f32.mrf.mxu1 }
 0xb92   : > { %1576 = vmatmul.mubr.msk.bf16.vlgmr.msra.gmra.mxu0 %vm507_vm2, %v1088_v17 }
 0xb93   : > { %v1085_v20 = vpop.f32.mrf.mxu1  ;;  %1603 = vmatprep.mubr.msk.bf16.mxu0 %vm1754_vm1, %v1753_v4 }
 0xb95   : > { %v1572_v21 = vpop.f32.mrf.mxu1 }
 0xc52   : > { %v1129_v23 = vpop.f32.mrf.mxu0 }
 0xc53   : > { %v1135_v26 = vadd.f32 %v1129_v23, %v977_v5 }
 0xc54   : > { %v1577_v27 = vpop.f32.mrf.mxu0 }
 0xc55   : > { %v1143_v28 = vadd.f32 %v1441_v24, %v1135_v26 }
 0xc56   : > { %v1132_v29 = vpop.f32.mrf.mxu0 }
 0xc57   : > { %1144 = vst.msk [vmem:[#allocation2] sm:$0xff] %vm412_vm0, %v1143_v28 }
 0xc58   : > { %v1578_v30 = vpop.f32.mrf.mxu0 }
 0xc5e   : > { %v1145_v31 = vld [vmem:[#allocation2] sm:$0xff] }
 0xc5f   : > { %v1146_v32 = vadd.f32 %v1145_v31, %v1885_v0  ;;  %v1663_v0 = vld [vmem:[%s2136_s10 + $0x38] sm:$0xff]  }
 0xc60   : > { %1588 = vmatpush3.bf16.msra.mxu0 %v1663_v0 }
 0xc61   : > { %v1147_v33 = vmul.f32 %v1146_v32, %v1146_v32  ;;  %1589 = vmatprep.subr.bf16.mxu0 %v1753_v4 }
 0xc63   : > { %v1148_v34 = vsel %vm412_vm0, %v1147_v33, 0.0 }
 0xc64   : > { %1149 = vadd.xlane.f32.xlu1 %v1148_v34  ;;  %1590 = vmatpush3.bf16.msra.mxu0 %v1664_v37 }
 0xc65   : > { %1591 = vmatprep.subr.bf16.mxu0 %v1753_v4 }
 0xc68   : > { %1592 = vmatpush3.bf16.msra.mxu0 %v1665_v38 }
 0xc69   : > { %1593 = vmatprep.subr.bf16.mxu0 %v1753_v4 }
 0xc6c   : > { %1594 = vmatpush3.bf16.msra.mxu0 %v1666_v39 }
 0xc6d   : > { %1595 = vmatprep.subr.bf16.mxu0 %v1753_v4 }
 0xc70   : > { %1596 = vmatpush3.bf16.msra.mxu0 %v1667_v40 }
 0xc71   : > { %1597 = vmatprep.subr.bf16.mxu0 %v1753_v4 }
 0xc74   : > { %1598 = vmatpush3.bf16.msra.mxu0 %v1668_v41 }
 0xc75   : > { %1599 = vmatprep.subr.bf16.mxu0 %v1753_v4 }
 0xc78   : > { %1600 = vmatpush3.bf16.msra.mxu0 %v1669_v49 }
 0xc79   : > { %1601 = vmatprep.subr.bf16.mxu0 %v1753_v4  ;;  %v1447_v4 = vld [vmem:[%s2137_s11] ss:$0 sm:$0xff] }
 0xc7c   : > { %1602 = vmatpush3.bf16.msra.mxu0 %v1670_v50 }
 0xced   : > { %v1150_v42 = vpop.xlane.xlu1 %1149 }
 0xcee   : > { %v1151_v22 = vmul.f32 0.03125, %v1150_v42 }
 0xcf0   : > { %v1152_v43 = vadd.f32 1e-06, %v1151_v22 }
 0xcf2   : > { %1689 = vrsqrt.f32 %v1152_v43 }
 0xcff   : > { %v1690_v44 = vpop.eup %1689 }
 0xd00   : > { %v1154_v46 = vmul.f32 %v1690_v44, %v1146_v32 }
 0xd02   : > { %v1162_v47 = vmul.f32 %v1442_v45, %v1154_v46 }
 0xd04   : > { %v1163_v48 = vpack.c.bf16 %v1162_v47, %v1162_v47 }
 0xd06   : > { %1584 = vmatmul.mubr.msk.bf16.vlgmr.msra.gmra.mxu1 %vm412_vm0, %v1163_v48 }
 0xdc6   : > { %v1224_v52 = vpop.f32.mrf.mxu1 }
 0xdc7   : > { %v1225_v53 = vadd.f32 %v1443_v51, %v1224_v52 }
 0xdc8   : > { %v1585_v54 = vpop.f32.mrf.mxu1 }
 0xdc9   : > { %v1230_v55 = vmax.f32 %v1225_v53, 0.0 }
 0xdca   : > { %v1227_v56 = vpop.f32.mrf.mxu1 }
 0xdcb   : > { %v1231_v57 = vpack.c.bf16 %v1230_v55, %v1230_v55 }
 0xdcc   : > { %v1586_v58 = vpop.f32.mrf.mxu1 }
 0xdcd   : > { %1604 = vmatmul.mubr.bf16.vlgmr.msra.gmra.mxu0 %v1231_v57 }
 0xe8d   : > { %v1337_v59 = vpop.f32.mrf.mxu0 }
 0xe8e   : > { %v1338_v60 = vadd.f32 %v1447_v4, %v1337_v59 }
 0xe8f   : > { %v1605_v61 = vpop.f32.mrf.mxu0 }
 0xe90   : > { %v1343_v62 = vadd.f32 %v1338_v60, %v1146_v32 }
 0xe91   : > { %v1340_v63 = vpop.f32.mrf.mxu0 }
 0xe92   : > { %1344 = vst.msk [vmem:[%s404_s17] sm:$0xff] %vm412_vm0, %v1343_v62 }
 0xe93   : > { %v1606_v1 = vpop.f32.mrf.mxu0 }
 0xe94   : > { %1704 = shalt.err (!%p1701_p3)
}
 0xe95   : > { %s1705_s17 = scalar_lea.hbm %s2084_s0, 128  ;;  %s1709_s20 = scalar_lea.hbm %s2138_s12, 256 }
 0xe96   : > { %p1706_p4 = scmp.ne.s32.totalorder %s2084_s0, %s1705_s17  ;;  %p1710_p9 = scmp.lt.s32.totalorder %s2084_s0, %s2138_s12 }
 0xe97   : > { %p1711_p10 = scmp.lt.s32.totalorder %s1709_s20, %s1705_s17 }
 0xe98   : > { %p1707_p7 = pnand %p1706_p4, %p1870_p5 }
 0xe99   : > { %p1712_p11 = por %p1711_p10, %p1710_p9 }
 0xe9a   : > { %p1708_p8 = pneg %p1707_p7 }
 0xe9c   : > { %p1713_p12 = pnand %p1712_p11, %p1708_p8 }
 0xe9e   : > { %1716 = shalt.err (!%p1713_p12)
}
 0xe9f   : > { %1607 = dma.vmem_to_hbm [thread:$0]  (%p1870_p5), %s2086_s18, 128, %s2084_s0, %s1346_s25  }
 0xea0 PF: > { %p1613_p13 = scmp.ge.s32.totalorder %s1751_s24, 2  ;;  %s1371_s28 = sand.u32 1, %s1739_s21  }
 0xea1   : > { %s1372_s1 = scalar_lea.sflag [#allocation4], %s1371_s28 }
 0xea2   : > { %p1610_p0 = pnand %p1613_p13, %p1874_p6 }
 0xea4   : > { %p1611_p1 = pneg %p1610_p0 }
 0xea6   : > { %1734 = dma.done.wait (%p1611_p1), %s1372_s1, 128  }
 0xea7   : > { %1736 = vsyncadd (%p1611_p1), %s1372_s1, 4294967168  ;;  %p22_p2 = scmp.ge.s32.totalorder %s1857_s27, 4   ;;  %s2145_s21 = smov %s1743_s22 }
 0xea8   : > { %s2146_s22 = smov %s1747_s23  ;;  %s2147_s23 = smov %s1868_s30 }
 0xea9   : > { %s2148_s24 = smov %s1857_s27  ;;  %24 = sbr.rel (!%p22_p2) target bundleno = 6 (0x6), region = 103 }
 0xeae   :  { %1377 = vsyncpa [#allocation4], 1 }
 0xeaf   :  { %1379 = vsyncpa [#allocation4 + $0x1], 1 }

</bundles_post_ra>
